<compile_context>
chip_gen: v7x
topology: tpu7x:2x2x1
jax: 0.10.0
libtpu: 0.0.40
codegen_flags: <defaults>
</compile_context>

<pallas_src>
import math

import jax
import jax.numpy as jnp
from jax.experimental import pallas as pl
from jax.experimental.pallas import tpu as pltpu


def _rope_kernel(start_ref, aux_ref, q_ref, k_ref, qo_ref, ko_ref):
    # q_ref/k_ref/qo_ref/ko_ref: (tS, H*D) tiles.
    # aux_ref: (2, H*D) f32 — row 0: inv_freq per lane, row 1: -1 on even lanes,
    # +1 on odd lanes.
    tS, HD = q_ref.shape

    start = start_ref[0]                        # runtime scalar from SMEM
    s_tile = pl.program_id(1)

    row = jax.lax.broadcasted_iota(jnp.int32, (tS, HD), 0)
    pos = (row + (s_tile * tS + start)).astype(jnp.float32)

    inv_freq = aux_ref[0:1, :]                  # (1, HD) f32
    sign = aux_ref[1:2, :]                      # (1, HD) f32: -1 even, +1 odd

    theta = pos * inv_freq                      # (tS, HD)
    cos = jnp.cos(theta)
    sin_signed = jnp.sin(theta) * sign          # -sin on even lanes, +sin on odd
    even = sign < 0.0                           # (1, HD) bool

    def rotate(x_ref, out_ref):
        x = x_ref[...].astype(jnp.float32)
        # adjacent-lane swap: even lane j takes x[j+1], odd lane j takes x[j-1]
        nbr_up = pltpu.roll(x, shift=HD - 1, axis=1)   # == roll by -1: x[j+1]
        nbr_dn = pltpu.roll(x, shift=1, axis=1)        # x[j-1]
        swapped = jnp.where(even, nbr_up, nbr_dn)
        # even lane: e*cos - o*sin ; odd lane: o*cos + e*sin
        out_ref[...] = (x * cos + swapped * sin_signed).astype(out_ref.dtype)

    rotate(q_ref, qo_ref)
    rotate(k_ref, ko_ref)


def _pick_seq_tile(S, HD, itemsize, budget_bytes=3 * 1024 * 1024):
    """Largest seq tile (multiple of 8, divisor of S) with tile <= budget_bytes."""
    row_bytes = max(1, HD * itemsize)
    budget_rows = max(8, budget_bytes // row_bytes)
    if S <= budget_rows:
        return S
    t = (budget_rows // 8) * 8
    while t >= 8:
        if S % t == 0:
            return t
        t -= 8
    return S  # fallback: full sequence (always a valid block)


def rotary_position_embedding(query, key, seq_len, start_pos=0):
    """Pallas implementation of RotaryPositionEmbedding.forward.

    query, key: [B, S, H, D]; returns (query_rot, key_rot) in query.dtype.
    start_pos may be a Python int or a traced int scalar (no recompilation).
    """
    B, S, H, D = query.shape
    assert key.shape == (B, S, H, D)
    assert seq_len == S, "freqs_cis must broadcast against query axis 1"
    assert D % 2 == 0
    HD = H * D

    # Per-lane frequency / parity patterns of the flattened (H, D) axis (tiny).
    d_idx = jnp.arange(HD, dtype=jnp.int32) % D
    pair = d_idx // 2
    inv_freq_lane = jnp.exp(pair.astype(jnp.float32) *
                            jnp.float32(-2.0 * math.log(10000.0) / D))
    sign_lane = jnp.where(d_idx % 2 == 0, -1.0, 1.0).astype(jnp.float32)
    aux = jnp.stack([inv_freq_lane, sign_lane], axis=0)        # (2, HD) f32

    # Collapse (H, D) -> H*D: contiguous trailing dims, free reshape, lane-dense.
    q2 = query.reshape(B, S, HD)
    k2 = key.reshape(B, S, HD)

    tS = _pick_seq_tile(S, HD, query.dtype.itemsize)
    n_s = S // tS

    start_arr = jnp.asarray([start_pos], dtype=jnp.int32)      # runtime scalar

    qk_spec = pl.BlockSpec((pl.Squeezed(), tS, HD), lambda b, s, start: (b, s, 0))
    aux_spec = pl.BlockSpec((2, HD), lambda b, s, start: (0, 0))
    out_sds = jax.ShapeDtypeStruct((B, S, HD), query.dtype)

    q3, k3 = pl.pallas_call(
        _rope_kernel,
        out_shape=(out_sds, out_sds),
        grid_spec=pltpu.PrefetchScalarGridSpec(
            num_scalar_prefetch=1,
            grid=(B, n_s),
            in_specs=[aux_spec, qk_spec, qk_spec],
            out_specs=[qk_spec, qk_spec],
        ),
        compiler_params=pltpu.CompilerParams(
            dimension_semantics=("parallel", "parallel"),
            vmem_limit_bytes=48 * 1024 * 1024,
        ),
    )(start_arr, aux, q2, k2)

    return q3.reshape(B, S, H, D), k3.reshape(B, S, H, D)


def _reference_rope(query, key, seq_len, start_pos=0):
    """Pure-JAX reference mirroring the PyTorch complex-arithmetic forward."""
    t = query.dtype
    B, S, H, D = query.shape
    P = D // 2
    inv_freq = 1.0 / (10000.0 ** (jnp.arange(0, D, 2)[:P].astype(jnp.float32) / D))
    pos = jnp.arange(start_pos, start_pos + seq_len, dtype=jnp.float32)
    theta = pos[:, None] * inv_freq[None, :]                  # (S, P)
    cos = jnp.cos(theta)[None, :, None, :]
    sin = jnp.sin(theta)[None, :, None, :]

    def apply(x):
        xr = x.astype(jnp.float32).reshape(B, S, H, P, 2)
        e, o = xr[..., 0], xr[..., 1]
        oe = e * cos - o * sin
        oo = e * sin + o * cos
        return jnp.stack([oe, oo], axis=-1).reshape(B, S, H, D).astype(t)

    return apply(query), apply(key)


if __name__ == "__main__":
    B, S, H, D = 2, 8, 4, 32       # H*D = 128 -> lane-dense last dim
    start_pos = 3

    k0 = jax.random.PRNGKey(0)
    kq, kk = jax.random.split(k0)
    query = jax.random.normal(kq, (B, S, H, D), dtype=jnp.float32)
    key = jax.random.normal(kk, (B, S, H, D), dtype=jnp.float32)

    q_out, k_out = rotary_position_embedding(query, key, seq_len=S, start_pos=start_pos)
    jax.block_until_ready((q_out, k_out))

    q_ref, k_ref = _reference_rope(query, key, seq_len=S, start_pos=start_pos)

    assert q_out.dtype == query.dtype and k_out.dtype == key.dtype
    assert jnp.allclose(q_out, q_ref, rtol=1e-5, atol=1e-5)
    assert jnp.allclose(k_out, k_ref, rtol=1e-5, atol=1e-5)

    print("KERNEL_OK")
</pallas_src>

<mosaic_0001>
module attributes {stable_mosaic.version = 11 : i64} {
  func.func @_rope_kernel(%arg0: i32, %arg1: i32, %arg2: memref<1xi32, #tpu.memory_space<smem>>, %arg3: memref<2x128xf32, #tpu.memory_space<vmem>>, %arg4: memref<1x8x128xf32, #tpu.memory_space<vmem>>, %arg5: memref<1x8x128xf32, #tpu.memory_space<vmem>>, %arg6: memref<1x8x128xf32, #tpu.memory_space<vmem>>, %arg7: memref<1x8x128xf32, #tpu.memory_space<vmem>>) attributes {dimension_semantics = [#tpu.dimension_semantics<parallel>, #tpu.dimension_semantics<parallel>], iteration_bounds = array<i64: 2, 1>, scalar_prefetch = 1 : i64, scratch_operands = 0 : i64, tpu.core_type = #tpu.core_type<tc>, window_params = [{pipeline_mode = #tpu.pipeline_mode<synchronous>, transform_indices = @transform_0, window_bounds = array<i64: 2, 128>}, {transform_indices = @transform_1, window_bounds = array<i64: 1, 8, 128>}, {transform_indices = @transform_2, window_bounds = array<i64: 1, 8, 128>}, {transform_indices = @transform_3, window_bounds = array<i64: 1, 8, 128>}, {transform_indices = @transform_4, window_bounds = array<i64: 1, 8, 128>}]} {
    %c0 = arith.constant 0 : index
    %0 = memref.load %arg2[%c0] : memref<1xi32, #tpu.memory_space<smem>>
    %1 = tpu.iota {dimensions = array<i32: 0>} : vector<8x128xi32>
    %c8_i32 = arith.constant 8 : i32
    %2 = arith.muli %arg1, %c8_i32 : i32
    %3 = arith.addi %2, %0 : i32
    %4 = vector.broadcast %3 : i32 to vector<8x128xi32>
    %5 = arith.addi %1, %4 : vector<8x128xi32>
    %6 = arith.sitofp %5 : vector<8x128xi32> to vector<8x128xf32>
    %c0_0 = arith.constant 0 : index
    %c0_1 = arith.constant 0 : index
    %7 = vector.load %arg3[%c0_0, %c0_1] : memref<2x128xf32, #tpu.memory_space<vmem>>, vector<1x128xf32>
    %c1 = arith.constant 1 : index
    %c0_2 = arith.constant 0 : index
    %8 = vector.load %arg3[%c1, %c0_2] : memref<2x128xf32, #tpu.memory_space<vmem>>, vector<1x128xf32>
    %9 = vector.broadcast %7 : vector<1x128xf32> to vector<8x128xf32>
    %10 = arith.mulf %6, %9 : vector<8x128xf32>
    %11 = math.cos %10 : vector<8x128xf32>
    %12 = math.sin %10 : vector<8x128xf32>
    %13 = vector.broadcast %8 : vector<1x128xf32> to vector<8x128xf32>
    %14 = arith.mulf %12, %13 : vector<8x128xf32>
    %cst = arith.constant 0.000000e+00 : f32
    %15 = vector.broadcast %cst : f32 to vector<1x128xf32>
    %16 = arith.cmpf olt, %8, %15 : vector<1x128xf32>
    %c0_3 = arith.constant 0 : index
    %c0_4 = arith.constant 0 : index
    %c0_5 = arith.constant 0 : index
    %17 = vector.load %arg4[%c0_3, %c0_4, %c0_5] : memref<1x8x128xf32, #tpu.memory_space<vmem>>, vector<1x8x128xf32>
    %18 = vector.shape_cast %17 : vector<1x8x128xf32> to vector<8x128xf32>
    %c127_i32 = arith.constant 127 : i32
    %19 = tpu.dynamic_rotate %18 by %c127_i32 dim 1 : vector<8x128xf32>, i32 -> vector<8x128xf32>
    %c1_i32 = arith.constant 1 : i32
    %20 = tpu.dynamic_rotate %18 by %c1_i32 dim 1 : vector<8x128xf32>, i32 -> vector<8x128xf32>
    %21 = vector.shape_cast %16 : vector<1x128xi1> to vector<1x128xi1>
    %22 = vector.broadcast %21 : vector<1x128xi1> to vector<8x128xi1>
    %23 = arith.select %22, %19, %20 : vector<8x128xi1>, vector<8x128xf32>
    %24 = arith.mulf %18, %11 : vector<8x128xf32>
    %25 = arith.mulf %23, %14 : vector<8x128xf32>
    %26 = arith.addf %24, %25 : vector<8x128xf32>
    %c0_6 = arith.constant 0 : index
    %c0_7 = arith.constant 0 : index
    %c0_8 = arith.constant 0 : index
    %27 = vector.load %arg6[%c0_6, %c0_7, %c0_8] : memref<1x8x128xf32, #tpu.memory_space<vmem>>, vector<1x8x128xf32>
    %28 = vector.shape_cast %27 : vector<1x8x128xf32> to vector<8x128xf32>
    %29 = vector.shape_cast %26 : vector<8x128xf32> to vector<1x8x128xf32>
    tpu.vector_store %arg6[%c0_6, %c0_7, %c0_8], %29 {strides = array<i32>} : memref<1x8x128xf32, #tpu.memory_space<vmem>>, vector<1x8x128xf32>,
    %c0_9 = arith.constant 0 : index
    %c0_10 = arith.constant 0 : index
    %c0_11 = arith.constant 0 : index
    %30 = vector.load %arg5[%c0_9, %c0_10, %c0_11] : memref<1x8x128xf32, #tpu.memory_space<vmem>>, vector<1x8x128xf32>
    %31 = vector.shape_cast %30 : vector<1x8x128xf32> to vector<8x128xf32>
    %c127_i32_12 = arith.constant 127 : i32
    %32 = tpu.dynamic_rotate %31 by %c127_i32_12 dim 1 : vector<8x128xf32>, i32 -> vector<8x128xf32>
    %c1_i32_13 = arith.constant 1 : i32
    %33 = tpu.dynamic_rotate %31 by %c1_i32_13 dim 1 : vector<8x128xf32>, i32 -> vector<8x128xf32>
    %34 = vector.shape_cast %16 : vector<1x128xi1> to vector<1x128xi1>
    %35 = vector.broadcast %34 : vector<1x128xi1> to vector<8x128xi1>
    %36 = arith.select %35, %32, %33 : vector<8x128xi1>, vector<8x128xf32>
    %37 = arith.mulf %31, %11 : vector<8x128xf32>
    %38 = arith.mulf %36, %14 : vector<8x128xf32>
    %39 = arith.addf %37, %38 : vector<8x128xf32>
    %c0_14 = arith.constant 0 : index
    %c0_15 = arith.constant 0 : index
    %c0_16 = arith.constant 0 : index
    %40 = vector.load %arg7[%c0_14, %c0_15, %c0_16] : memref<1x8x128xf32, #tpu.memory_space<vmem>>, vector<1x8x128xf32>
    %41 = vector.shape_cast %40 : vector<1x8x128xf32> to vector<8x128xf32>
    %42 = vector.shape_cast %39 : vector<8x128xf32> to vector<1x8x128xf32>
    tpu.vector_store %arg7[%c0_14, %c0_15, %c0_16], %42 {strides = array<i32>} : memref<1x8x128xf32, #tpu.memory_space<vmem>>, vector<1x8x128xf32>,
    return
  }
  func.func @transform_0(%arg0: i32, %arg1: i32, %arg2: memref<1xi32, #tpu.memory_space<smem>>) -> (i32, i32) {
    %c0_i32 = arith.constant 0 : i32
    %c0_i32_0 = arith.constant 0 : i32
    %c0_i32_1 = arith.constant 0 : i32
    return %c0_i32, %c0_i32_0 : i32, i32
  }
  func.func @transform_1(%arg0: i32, %arg1: i32, %arg2: memref<1xi32, #tpu.memory_space<smem>>) -> (i32, i32, i32) {
    %c0_i32 = arith.constant 0 : i32
    %c0_i32_0 = arith.constant 0 : i32
    return %arg0, %arg1, %c0_i32 : i32, i32, i32
  }
  func.func @transform_2(%arg0: i32, %arg1: i32, %arg2: memref<1xi32, #tpu.memory_space<smem>>) -> (i32, i32, i32) {
    %c0_i32 = arith.constant 0 : i32
    %c0_i32_0 = arith.constant 0 : i32
    return %arg0, %arg1, %c0_i32 : i32, i32, i32
  }
  func.func @transform_3(%arg0: i32, %arg1: i32, %arg2: memref<1xi32, #tpu.memory_space<smem>>) -> (i32, i32, i32) {
    %c0_i32 = arith.constant 0 : i32
    %c0_i32_0 = arith.constant 0 : i32
    return %arg0, %arg1, %c0_i32 : i32, i32, i32
  }
  func.func @transform_4(%arg0: i32, %arg1: i32, %arg2: memref<1xi32, #tpu.memory_space<smem>>) -> (i32, i32, i32) {
    %c0_i32 = arith.constant 0 : i32
    %c0_i32_0 = arith.constant 0 : i32
    return %arg0, %arg1, %c0_i32 : i32, i32, i32
  }
}

</mosaic_0001>

<bundles_post_ra>
// kernel: tpu_custom_call.1
= control target key start
LH: loop header
LB: loop body
LE: loop exit
PB: predicated region body
PF: predicated region fallthrough
CT: control target
= control target key end

     0   :  { %s1353_s0 = inlined_call_operand.<no memory space> [shape: s32[1], index: 0, kind: input, shape index: {}]   ;;  %s1354_s1 = inlined_call_operand.vmem [shape: f32[2,128], index: 1, kind: input, shape index: {}]   ;;  %s1355_s2 = inlined_call_operand.hbm [shape: f32[2,8,128], index: 2, kind: input, shape index: {}]   ;;  %s1356_s3 = inlined_call_operand.hbm [shape: f32[2,8,128], index: 3, kind: input, shape index: {}]   ;;  %s1357_s4 = inlined_call_operand.hbm [shape: f32[2,8,128], index: 4, kind: output, shape index: {0}]   ;;  %s1358_s5 = inlined_call_operand.hbm [shape: f32[2,8,128], index: 5, kind: output, shape index: {1}]  }
   0x1   :  { %11 = sst [smem:[#allocation3]] %s1353_s0 }
   0x2   :  { %12 = vsyncpa [#allocation5], 0 }
   0x3   :  { %14 = vsyncpa [#allocation5 + $0x1], 0 }
   0x4   :  { %15 = vsyncpa [#allocation8], 0 }
   0x5   :  { %17 = vsyncpa [#allocation8 + $0x1], 0 }
   0x6   :  { %18 = vsyncpa [#allocation6], 0 }
   0x7   :  { %20 = vsyncpa [#allocation6 + $0x1], 0 }
   0x8   :  { %21 = vsyncpa [#allocation11], 0 }
   0x9   :  { %23 = vsyncpa [#allocation11 + $0x1], 0  ;;  %s1053_s20 = smov 0   ;;  %s1055_s21 = smov 0  }
   0xa   :  { %s1057_s22 = smov 0   ;;  %s1059_s23 = smov 0  }
   0xb   :  { %s1061_s24 = smov 0   ;;  %s1063_s25 = smov 0  }
   0xc LB: > { %s710_s0 = sadd.s32 4294967295, %s1005_s25   ;;  %s711_s26 = sadd.s32 4294967294, %s1005_s25   ;;  %s1005_s25 = sphi %s1063_s25, %s29_s25   ;;  %s1001_s24 = sphi %s1061_s24, %s1378_s24   ;;  %s997_s23 = sphi %s1059_s23, %s1377_s23   ;;  %s993_s22 = sphi %s1057_s22, %s1376_s22   ;;  %s989_s21 = sphi %s1055_s21, %s1375_s21   ;;  %s985_s20 = sphi %s1053_s20, %s1374_s20  }
   0xd   : > { %s41_s27 = sadd.s32 1, %s1001_s24  ;;  %s71_s28 = sadd.s32 1, %s993_s22 }
   0xe   : > { %p43_p0 = scmp.ge.s32.totalorder %s41_s27, 2  ;;  %p78_p1 = scmp.ne.s32.totalorder %s993_s22, %s989_s21 }
   0xf   : > { %p79_p2 = scmp.eq.s32.totalorder %s1005_s25, 0  ;;  %p84_p3 = scmp.ne.s32.totalorder %s989_s21, %s985_s20 }
  0x10   : > { %s1380_s27 = smov (%p43_p0, %s41_s27), 0  ;;  %p85_p5 = scmp.eq.s32.totalorder %s710_s0, 0 }
  0x11   : > { %p1094_p4 = por %p79_p2, %p78_p1  ;;  %s66_s30 = ssub.s32 %s1001_s24, %s1380_s27 }
  0x12   : > { %p138_p6 = scmp.eq.s32.totalorder %s710_s0, 1  ;;  %p69_p7 = scmp.eq.s32.totalorder %s66_s30, 0 }
  0x13   : > { %p1100_p8 = por %p85_p5, %p84_p3  ;;  %p144_p10 = scmp.eq.s32.totalorder %s711_s26, 1 }
  0x14   : > { %p1104_p9 = por %p138_p6, %p78_p1  ;;  %p764_p13 = scmp.lt.s32.totalorder %s1005_s25, 2 }
  0x15   : > { %s1362_s6 = scalar_select %p1100_p8, 1, 0 }
  0x16   : > { %s1363_s7 = scalar_select %p1104_p9, 1, 0 }
  0x17   : > { %s1109_s8 = scalar_select %p69_p7, %s993_s22, %s71_s28  }
  0x18   : > { %p1111_p11 = por %p144_p10, %p84_p3  ;;  %s1118_s10 = sand.u32 1, %s993_s22  }
  0x19   : > { %s714_s11 = sshll.u32 %s1118_s10, 3  ;;  %s715_s12 = sshll.u32 %s1001_s24, 7 }
  0x1a   : > { %s1364_s9 = scalar_select %p1111_p11, 1, 0 }
  0x1b   : > { %s1127_s15 = scalar_lea.hbm %s1355_s2, %s715_s12  ;;  %s199_s16 = scalar_lea.vmem [#allocation4], %s714_s11 }
  0x1c   : > { %s207_s17 = sshll.u32 %s199_s16, 4  ;;  %p1135_p0 = pnand %p764_p13, %p1094_p4  ;;  %s1131_s17 = int_to_ptr.vmem [resolvable:$true] %s207_s17 }
  0x1d   : > { %s196_s19 = scalar_lea.sflag [#allocation5], %s1118_s10  ;;  %s827_s0 = scalar_lea.hbm %s1127_s15, 128 }
  0x1e   : > { %p828_p3 = scmp.ne.s32.totalorder %s1127_s15, %s827_s0  ;;  %p829_p5 = pneg %p1135_p0 }
  0x1f   : > { %s832_s29 = scalar_lea.hbm %s1355_s2, 256  ;;  %p833_p4 = scmp.lt.u32.totalorder %s1127_s15, %s1355_s2 }
  0x20   : > { %p830_p6 = pnand %p829_p5, %p828_p3  ;;  %p834_p10 = scmp.lt.u32.totalorder %s832_s29, %s827_s0 }
  0x21   : > { %p836_p12 = scmp.lt.u32.totalorder %s827_s0, %s1127_s15 }
  0x22   : > { %p831_p7 = pneg %p830_p6  ;;  %p835_p13 = por %p834_p10, %p833_p4 }
  0x24   : > { %p837_p1 = por %p836_p12, %p835_p13 }
  0x26   : > { %p838_p2 = pnand %p837_p1, %p831_p7 }
  0x28   : > { %841 = shalt.err (!%p838_p2)
}
  0x29   : > { %s842_s14 = scalar_lea.vmem %s1131_s17, 128  ;;  %s1007_s16 = smov [#allocation4]  }
  0x2a   : > { %p843_p3 = scmp.ne.s32.totalorder %s1131_s17, %s842_s14  ;;  %s847_s26 = sshll.u32 %s1007_s16, 4  ;;  %s848_s26 = int_to_ptr.vmem [resolvable:$false] %s847_s26 }
  0x2b   : > { %s849_s28 = scalar_lea.vmem %s848_s26, 256  ;;  %p850_p9 = scmp.lt.s32.totalorder %s1131_s17, %s848_s26 }
  0x2c   : > { %p845_p6 = pnand %p843_p3, %p829_p5  ;;  %p851_p4 = scmp.lt.s32.totalorder %s849_s28, %s842_s14 }
  0x2e   : > { %p846_p11 = pneg %p845_p6  ;;  %p852_p10 = por %p851_p4, %p850_p9 }
  0x30   : > { %p853_p12 = pnand %p852_p10, %p846_p11 }
  0x32   : > { %856 = shalt.err (!%p853_p12)
}
  0x33   : > { %753 = dma.hbm_to_vmem [thread:$0]  (!%p1135_p0), %s1127_s15, 128, %s1131_s17, %s196_s19  }
  0x34   : > { %p1366_p1 = scmp.lt.s32.totalorder %s1005_s25, 3  ;;  %p1367_p2 = scmp.ge.s32.totalorder %s1005_s25, 1 }
  0x35   : > { %s1180_s13 = scalar_lea.hbm %s1356_s3, %s715_s12  ;;  %s218_s14 = scalar_lea.vmem [#allocation7], %s714_s11 }
  0x36   : > { %p1171_p7 = pnand %p1367_p2, %p1366_p1  ;;  %s226_s16 = sshll.u32 %s218_s14, 4  ;;  %s227_s16 = int_to_ptr.vmem [resolvable:$true] %s226_s16 }
  0x37   : > { %s215_s15 = scalar_lea.sflag [#allocation8], %s1118_s10  ;;  %s857_s17 = scalar_lea.hbm %s1180_s13, 128 }
  0x38   : > { %s1368_s0 = scalar_select %p1171_p7, 1, 0 }
  0x39   : > { %p858_p9 = scmp.ne.s32.totalorder %s1180_s13, %s857_s17  ;;  %s862_s12 = scalar_lea.hbm %s1356_s3, 256 }
  0x3a   : > { %p863_p3 = scmp.lt.u32.totalorder %s1180_s13, %s1356_s3  ;;  %p864_p6 = scmp.lt.u32.totalorder %s862_s12, %s857_s17 }
  0x3b   : > { %p860_p11 = pnand %p858_p9, %p829_p5  ;;  %p866_p10 = scmp.lt.u32.totalorder %s857_s17, %s1180_s13 }
  0x3c   : > { %p865_p4 = por %p864_p6, %p863_p3 }
  0x3d   : > { %p861_p13 = pneg %p860_p11 }
  0x3e   : > { %p867_p12 = por %p866_p10, %p865_p4 }
  0x40   : > { %p868_p1 = pnand %p867_p12, %p861_p13 }
  0x42   : > { %871 = shalt.err (!%p868_p1)
}
  0x43   : > { %s872_s10 = scalar_lea.vmem %s227_s16, 128  ;;  %s1008_s11 = smov [#allocation7]  }
  0x44   : > { %p873_p2 = scmp.ne.s32.totalorder %s227_s16, %s872_s10  ;;  %s877_s30 = sshll.u32 %s1008_s11, 4  ;;  %s878_s30 = int_to_ptr.vmem [resolvable:$false] %s877_s30 }
  0x45   : > { %s879_s14 = scalar_lea.vmem %s878_s30, 256  ;;  %p880_p8 = scmp.lt.s32.totalorder %s227_s16, %s878_s30 }
  0x46   : > { %p875_p9 = pnand %p873_p2, %p829_p5  ;;  %p881_p7 = scmp.lt.s32.totalorder %s879_s14, %s872_s10 }
  0x48   : > { %p876_p11 = pneg %p875_p9  ;;  %p882_p3 = por %p881_p7, %p880_p8 }
  0x4a   : > { %p883_p6 = pnand %p882_p3, %p876_p11 }
  0x4c   : > { %886 = shalt.err (!%p883_p6)
}
  0x4d   : > { %756 = dma.hbm_to_vmem [thread:$0]  (!%p1135_p0), %s1180_s13, 128, %s227_s16, %s215_s15  }
  0x4e   : > { %p1369_p13 = scmp.ne.s32.totalorder %s1368_s0, 0 }
  0x4f   : > { %s1207_s17 = sand.u32 (!%p1369_p13), 1, %s989_s21   ;;  %p1370_p8 = scmp.ne.s32.totalorder (!%p1369_p13), %s1362_s6, 0 }
  0x50   : > { %235 = sbr.rel (%p1369_p13) target bundleno = 252 (0xfc), region = 32  ;;  %s1210_s19 = sshll.u32 (!%p1369_p13), %s1207_s17, 3 }
  0x51   : > { %s238_s26 = scalar_lea.sflag (!%p1369_p13), [#allocation5], %s1207_s17  ;;  %s241_s12 = scalar_lea.vmem (!%p1369_p13), [#allocation4], %s1210_s19 }
  0x57   : > { %968 = dma.done.wait (%p1370_p8), %s238_s26, 128  }
  0x58   : > { %970 = vsyncadd (%p1370_p8), %s238_s26, 4294967168  ;;  %s247_s18 = scalar_lea.sflag [#allocation8], %s1207_s17  ;;  %s250_s0 = scalar_lea.vmem [#allocation7], %s1210_s19 }
  0x59   : > { %972 = dma.done.wait (%p1370_p8), %s247_s18, 128  }
  0x5a   : > { %974 = vsyncadd (%p1370_p8), %s247_s18, 4294967168  ;;  %v286_v0 = vlaneseq  ;;  %s285_s13 = sld [smem:[#allocation3]]  ;;  %v1226_v3 = vld [vmem:[%s250_s0] sm:$0xff]  ;;  %v1228_v4 = vld [vmem:[%s241_s12] sm:$0xff]  ;;  %s1009_s16 = smov 127  }
  0x5b   : > { %530 = vrot.lane.b32.xlu1 %v1226_v3, %s1009_s16  ;;  %514 = vrot.lane.b32.xlu0 %v1228_v4, %s1009_s16  ;;  %v723_v6 = vld [vmem:[%s1354_s1] ss:$0 sm:$0xff]  ;;  %s1010_s6 = smov 1   ;;  %v1011_v20 = vmov 683565275   ;;  %s734_s11 = sshll.u32 %s997_s23, 7 }
  0x5c   : > { %v1224_v1 = vshrl.u32 %v286_v0, 7  ;;  %v1012_v22 = vmov 2475754826   ;;  %v1013_v24 = vmov 2131351028   ;;  %s277_s30 = scalar_lea.vmem [#allocation9], %s1210_s19  ;;  %s1282_s15 = scalar_lea.hbm %s1358_s5, %s734_s11 }
  0x5d   : > { %v1014_v26 = vmov 2102212464   ;;  %v1015_v28 = vmov 920167782   ;;  %v1016_v35 = vmov 1326507024  }
  0x5e   : > { %s559_s14 = sshll.u32 %s277_s30, 4  ;;  %s284_s26 = scalar_lea.vmem [#allocation10], %s1210_s19  ;;  %s1277_s14 = int_to_ptr.vmem [resolvable:$true] %s559_s14 }
  0x5f   : > { %532 = vrot.lane.b32.xlu1 %v1226_v3, %s1010_s6  ;;  %516 = vrot.lane.b32.xlu0 %v1228_v4, %s1010_s6  ;;  %s573_s12 = sshll.u32 %s284_s26, 4  ;;  %s540_s19 = scalar_lea.sflag [#allocation6], %s1207_s17  ;;  %s1284_s12 = int_to_ptr.vmem [resolvable:$true] %s573_s12 }
  0x60   : > { %v290_v2 = vstv %s285_s13  ;;  %s1275_s13 = scalar_lea.hbm %s1357_s4, %s734_s11  ;;  %s887_s28 = scalar_lea.vmem %s1277_s14, 128 }
  0x61   : > { %v291_v5 = vadd.s32 %v290_v2, %v1224_v1  ;;  %p888_p0 = scmp.ne.s32.totalorder %s1277_s14, %s887_s28  ;;  %p1371_p5 = scmp.ne.s32.totalorder %s1363_s7, 0 }
  0x62   : > { %s1018_s6 = smov [#allocation9]  }
  0x63   : > { %v292_v7 = vcvt.s32.f32 %v291_v5  ;;  %p889_p7 = pnand %p888_p0, %p1371_p5  ;;  %s891_s29 = sshll.u32 %s1018_s6, 4  ;;  %s892_s29 = int_to_ptr.vmem [resolvable:$false] %s891_s29 }
  0x64   : > { %s893_s10 = scalar_lea.vmem %s892_s29, 256  ;;  %p894_p10 = scmp.lt.s32.totalorder %s1277_s14, %s892_s29 }
  0x65   : > { %v1236_v8 = vmul.f32 %v723_v6, %v292_v7  ;;  %p890_p4 = pneg %p889_p7  ;;  %p895_p12 = scmp.lt.s32.totalorder %s893_s10, %s887_s28 }
  0x67   : > { %v303_v9 = vand.u32 2139095040, %v1236_v8  ;;  %v300_v11 = vand.u32 2147483647, %v1236_v8  ;;  %vm302_vm7 = vcmp.lt.s32.totalorder %v1236_v8, 0  ;;  %vm392_vm12 = vweird.f32 %v1236_v8  ;;  %p896_p1 = por %p895_p12, %p894_p10 }
  0x69   : > { %v304_v10 = vshrl.u32 %v303_v9, 23  ;;  %v307_v14 = vand.u32 8388607, %v300_v11  ;;  %vm301_vm8 = vcmp.le.f32.partialorder %v300_v11, 0.7853982  ;;  %p897_p2 = pnand %p896_p1, %p890_p4 }
  0x6a   : > { %v294_v11 = vld [vmem:[%s1354_s1 + $0x1] sm:$0x1] }
  0x6b   : > { %v724_v12 = vadd.s32 4294967169, %v304_v10  ;;  %v308_v17 = vor.u32 8388608, %v307_v14  ;;  %vm512_vm15 = vcmp.lt.f32.partialorder %v294_v11, 0.0 }
  0x6d   : > { %v310_v13 = vadd.s32 1, %v724_v12  ;;  %v348_v37 = vshll.u32 %v308_v17, 8 }
  0x6f   : > { %vm311_vm0 = vcmp.gt.s32.totalorder %v310_v13, 0 }
  0x70   : > { %v312_v15 = vsel %vm311_vm0, %v310_v13, 0 }
  0x71   : > { %v314_v16 = vand.u32 31, %v312_v15  ;;  %v313_v18 = vshrl.u32 %v312_v15, 5 }
  0x73   : > { %v315_v19 = vsub.s32 32, %v314_v16  ;;  %v317_v21 = vshll.u32 %v1011_v20, %v314_v16  ;;  %v320_v23 = vshll.u32 %v1012_v22, %v314_v16  ;;  %v323_v25 = vshll.u32 %v1013_v24, %v314_v16 }
  0x74   : > { %v326_v27 = vshll.u32 %v1014_v26, %v314_v16  ;;  %v329_v29 = vshll.u32 %v1015_v28, %v314_v16  ;;  %vm332_vm1 = vcmp.lt.s32.totalorder %v313_v18, 1  ;;  %vm335_vm2 = vcmp.lt.s32.totalorder %v313_v18, 4 }
  0x75   : > { %v316_v30 = vshrl.u32 %v1011_v20, %v315_v19  ;;  %v318_v31 = vshrl.u32 %v1012_v22, %v315_v19  ;;  %v321_v32 = vshrl.u32 %v1013_v24, %v315_v19  ;;  %v324_v33 = vshrl.u32 %v1014_v26, %v315_v19 }
  0x76   : > { %v327_v34 = vshrl.u32 %v1015_v28, %v315_v19  ;;  %v330_v36 = vshrl.u32 %v1016_v35, %v315_v19  ;;  %vm333_vm3 = vcmp.lt.s32.totalorder %v313_v18, 2  ;;  %vm334_vm4 = vcmp.lt.s32.totalorder %v313_v18, 3 }
  0x77   : > { %v319_v38 = vor.u32 %v318_v31, %v317_v21  ;;  %v322_v39 = vor.u32 %v321_v32, %v320_v23  ;;  %v325_v40 = vor.u32 %v324_v33, %v323_v25  ;;  %v509_v33 = vsub.s32 0, %v1224_v1 }
  0x78   : > { %v328_v41 = vor.u32 %v327_v34, %v326_v27  ;;  %v331_v42 = vor.u32 %v330_v36, %v329_v29 }
  0x79   : > { %v336_v43 = vsel %vm332_vm1, %v316_v30, %v319_v38  ;;  %v337_v44 = vsel %vm335_vm2, %v325_v40, 2102212464  ;;  %v340_v45 = vsel %vm332_vm1, %v319_v38, %v322_v39  ;;  %v344_v46 = vsel %vm332_vm1, %v322_v39, %v325_v40 }
  0x7a   : > { %v338_v47 = vsel %vm334_vm4, %v322_v39, %v337_v44  ;;  %v341_v48 = vsel %vm335_vm2, %v328_v41, 920167782  ;;  %v345_v49 = vsel %vm335_vm2, %v331_v42, 1326507024  ;;  %v510_v39 = vrot.slane %v294_v11, %v509_v33 }
  0x7b   : > { %v342_v50 = vsel %vm334_vm4, %v325_v40, %v341_v48  ;;  %v346_v51 = vsel %vm334_vm4, %v328_v41, %v345_v49  ;;  %v339_v52 = vsel %vm333_vm3, %v336_v43, %v338_v47 }
  0x7c   : > { %v343_v53 = vsel %vm333_vm3, %v340_v45, %v342_v50  ;;  %v347_v54 = vsel %vm333_vm3, %v344_v46, %v346_v51  ;;  %v355_v59 = vmul.u32 %v348_v37, %v339_v52  ;;  %v1017_v46 = vmov 0  }
  0x7d   : > { %v1244_v55 = vmul.u32.u64.low %v348_v37, %v347_v54  ;;  %v1245_v56 = vmul.u32.u64.high %v348_v37, %v347_v54, %v1244_v55  ;;  %v1247_v57 = vmul.u32.u64.low %v348_v37, %v343_v53  ;;  %v1248_v58 = vmul.u32.u64.high %v348_v37, %v343_v53, %v1247_v57 }
  0x7e   : > { %v518_v47 = vsel %vm512_vm15, 1, %v1017_v46 }
  0x7f   : > { %vm357_vm5 = vc.u32 %v1245_v56, %v1247_v57  ;;  %v358_v60 = vadd.s32 1, %v1248_v58  ;;  %v356_v12 = vadd.s32 %v1247_v57, %v1245_v56  ;;  %v522_v49 = vrot.slane %v518_v47, %v509_v33 }
  0x81   : > { %v359_v61 = vsel %vm357_vm5, %v358_v60, %v1248_v58  ;;  %vm523_vm1 = vcmp.eq.s32.totalorder %v522_v49, 1 }
  0x82   : > { %v360_v62 = vadd.s32 %v359_v61, %v355_v59 }
  0x84   : > { %v361_v63 = vadd.s32 536870912, %v360_v62 }
  0x86   : > { %v362_v0 = vshrl.u32 %v361_v63, 30 }
  0x88   : > { %v363_v2 = vshll.u32 %v362_v0, 30  ;;  %v386_v24 = vsub.s32 4, %v362_v0 }
  0x8a   : > { %v364_v5 = vsub.s32 %v360_v62, %v363_v2  ;;  %v387_v27 = vsel %vm302_vm7, %v386_v24, %v362_v0 }
  0x8b   : > { %v389_v30 = vsel %vm301_vm8, 0, %v387_v27 }
  0x8c   : > { %v366_v6 = vsub.s32 0, %v364_v5  ;;  %v496_v31 = vadd.s32 3, %v389_v30  ;;  %v393_v43 = vand.u32 3, %v389_v30 }
  0x8e   : > { %v725_v7 = vmin.u32 %v366_v6, %v364_v5  ;;  %v497_v32 = vand.u32 3, %v496_v31  ;;  %vm395_vm13 = vcmp.eq.s32.totalorder %v393_v43, 0  ;;  %vm398_vm14 = vcmp.eq.s32.totalorder %v393_v43, 2 }
  0x8f   : > { %vm394_vm0 = vcmp.lt.s32.totalorder %v393_v43, 2 }
  0x90   : > { %v368_v9 = vclz %v725_v7  ;;  %vm502_vm9 = vcmp.eq.s32.totalorder %v497_v32, 2  ;;  %vm499_vm10 = vcmp.eq.s32.totalorder %v497_v32, 0  ;;  %vm498_vm11 = vcmp.lt.s32.totalorder %v497_v32, 2 }
  0x92   : > { %v726_v10 = vadd.s32 4294967294, %v368_v9 }
  0x94   : > { %vm727_vm6 = vcmp.lt.s32.totalorder %v726_v10, 0 }
  0x95   : > { %v371_v13 = vsel %vm727_vm6, 0, %v726_v10 }
  0x96   : > { %v372_v14 = vsub.s32 32, %v371_v13  ;;  %v373_v15 = vshll.u32 %v364_v5, %v371_v13  ;;  %v376_v16 = vsub.s32 4294967266, %v371_v13 }
  0x98   : > { %v374_v17 = vshrl.u32 %v356_v12, %v372_v14  ;;  %v377_v18 = vadd.s32 127, %v376_v16 }
  0x9a   : > { %v375_v19 = vor.u32 %v374_v17, %v373_v15  ;;  %v378_v20 = vshll.u32 %v377_v18, 23 }
  0x9c   : > { %v379_v21 = vor.u32 4788187, %v378_v20  ;;  %v382_v22 = vcvt.s32.f32 %v375_v19 }
  0x9e   : > { %v380_v23 = vand.u32 2147483647, %v379_v21 }
  0xa0   : > { %v383_v25 = vmul.f32 %v382_v22, %v380_v23 }
  0xa2   : > { %v384_v26 = vxor.u32 2147483648, %v383_v25 }
  0xa4   : > { %v385_v28 = vsel %vm302_vm7, %v384_v26, %v383_v25 }
  0xa5   : > { %v388_v29 = vsel %vm301_vm8, %v1236_v8, %v385_v28 }
  0xa6   : > { %823 = vcosq.f32 %v388_v29 }
  0xa7   : > { %825 = vsinq.f32 %v388_v29 }
  0xb0   : > { %v824_v34 = vpop.eup %823 }
  0xb1   : > { %v826_v35 = vpop.eup %825  ;;  %v399_v36 = vxor.u32 2147483648, %v824_v34 }
  0xb2   : > { %v396_v37 = vxor.u32 2147483648, %v826_v35 }
  0xb3   : > { %v504_v38 = vsel %vm502_vm9, %v399_v36, %v826_v35  ;;  %v400_v45 = vsel %vm398_vm14, %v399_v36, %v826_v35 }
  0xb4   : > { %v501_v40 = vsel %vm499_vm10, %v824_v34, %v396_v37  ;;  %v397_v44 = vsel %vm395_vm13, %v824_v34, %v396_v37 }
  0xb5   : > { %v505_v41 = vsel %vm498_vm11, %v501_v40, %v504_v38  ;;  %v401_v48 = vsel %vm394_vm0, %v397_v44, %v400_v45 }
  0xb6   : > { %v506_v1 = vsel %vm392_vm12, nan, %v505_v41  ;;  %v402_v52 = vsel %vm392_vm12, nan, %v401_v48 }
  0xb7   : > { %v511_v42 = vmul.f32 %v510_v39, %v506_v1  ;;  %v535_v53 = vmul.f32 %v1226_v3, %v402_v52  ;;  %v525_v54 = vmul.f32 %v1228_v4, %v402_v52 }
  0xcd   : > { %v531_v50 = vpop.permute.xlu1 %530  ;;  %v515_v51 = vpop.permute.xlu0 %514 }
  0xd1   : > { %v533_v55 = vpop.permute.xlu1 %532  ;;  %v517_v56 = vpop.permute.xlu0 %516 }
  0xd2   : > { %v534_v57 = vsel %vm523_vm1, %v531_v50, %v533_v55  ;;  %v524_v58 = vsel %vm523_vm1, %v515_v51, %v517_v56 }
  0xd3   : > { %v536_v59 = vmul.f32 %v534_v57, %v511_v42  ;;  %v526_v60 = vmul.f32 %v524_v58, %v511_v42 }
  0xd5   : > { %v537_v3 = vadd.f32 %v536_v59, %v535_v53  ;;  %v527_v4 = vadd.f32 %v526_v60, %v525_v54 }
  0xd7   : > { %528 = vst [vmem:[%s277_s30] sm:$0xff] %v527_v4  ;;  %538 = vst [vmem:[%s284_s26] sm:$0xff] %v537_v3 }
  0xd8   : > { %900 = shalt.err (!%p897_p2)
}
  0xd9   : > { %s901_s11 = scalar_lea.hbm %s1275_s13, 128  ;;  %s905_s18 = scalar_lea.hbm %s1357_s4, 256 }
  0xda   : > { %p902_p9 = scmp.ne.s32.totalorder %s1275_s13, %s901_s11  ;;  %p906_p6 = scmp.lt.u32.totalorder %s1275_s13, %s1357_s4 }
  0xdb   : > { %p907_p13 = scmp.lt.u32.totalorder %s905_s18, %s901_s11  ;;  %p909_p0 = scmp.lt.u32.totalorder %s901_s11, %s1275_s13 }
  0xdc   : > { %p903_p11 = pnand %p902_p9, %p1371_p5 }
  0xdd   : > { %p908_p8 = por %p907_p13, %p906_p6 }
  0xde   : > { %p904_p3 = pneg %p903_p11 }
  0xdf   : > { %p910_p7 = por %p909_p0, %p908_p8 }
  0xe1   : > { %p911_p4 = pnand %p910_p7, %p904_p3 }
  0xe3   : > { %914 = shalt.err (!%p911_p4)
}
  0xe4   : > { %746 = dma.vmem_to_hbm [thread:$0]  (%p1371_p5), %s1277_s14, 128, %s1275_s13, %s540_s19  }
  0xe5   : > { %s545_s16 = scalar_lea.sflag [#allocation11], %s1207_s17  ;;  %s915_s28 = scalar_lea.vmem %s1284_s12, 128 }
  0xe6   : > { %p916_p10 = scmp.ne.s32.totalorder %s1284_s12, %s915_s28  ;;  %s1019_s6 = smov [#allocation10]  }
  0xe7   : > { %s919_s29 = sshll.u32 %s1019_s6, 4  ;;  %s920_s29 = int_to_ptr.vmem [resolvable:$false] %s919_s29 }
  0xe8   : > { %p917_p12 = pnand %p916_p10, %p1371_p5  ;;  %s921_s10 = scalar_lea.vmem %s920_s29, 256 }
  0xe9   : > { %p922_p2 = scmp.lt.s32.totalorder %s1284_s12, %s920_s29  ;;  %p923_p9 = scmp.lt.s32.totalorder %s921_s10, %s915_s28 }
  0xea   : > { %p918_p1 = pneg %p917_p12 }
  0xeb   : > { %p924_p11 = por %p923_p9, %p922_p2 }
  0xed   : > { %p925_p3 = pnand %p924_p11, %p918_p1 }
  0xef   : > { %928 = shalt.err (!%p925_p3)
}
  0xf0   : > { %s929_s17 = scalar_lea.hbm %s1282_s15, 128  ;;  %s933_s19 = scalar_lea.hbm %s1358_s5, 256 }
  0xf1   : > { %p930_p6 = scmp.ne.s32.totalorder %s1282_s15, %s929_s17  ;;  %p934_p0 = scmp.lt.u32.totalorder %s1282_s15, %s1358_s5 }
  0xf2   : > { %p935_p7 = scmp.lt.u32.totalorder %s933_s19, %s929_s17  ;;  %p937_p10 = scmp.lt.u32.totalorder %s929_s17, %s1282_s15 }
  0xf3   : > { %p931_p13 = pnand %p930_p6, %p1371_p5 }
  0xf4   : > { %p936_p4 = por %p935_p7, %p934_p0 }
  0xf5   : > { %p932_p8 = pneg %p931_p13 }
  0xf6   : > { %p938_p12 = por %p937_p10, %p936_p4 }
  0xf8   : > { %p939_p1 = pnand %p938_p12, %p932_p8 }
  0xfa   : > { %942 = shalt.err (!%p939_p1)
}
  0xfb   : > { %747 = dma.vmem_to_hbm [thread:$0]  (%p1371_p5), %s1284_s12, 128, %s1282_s15, %s545_s16  }
  0xfc PF: > { %s585_s26 = sand.u32 1, %s985_s20   ;;  %p1372_p2 = scmp.ne.s32.totalorder %s1364_s9, 0 }
  0xfd   : > { %p1373_p9 = scmp.ge.s32.totalorder %s1005_s25, 2  ;;  %s586_s18 = scalar_lea.sflag [#allocation6], %s585_s26 }
  0xff   : > { %p758_p11 = pnand %p1373_p9, %p1372_p2 }
 0x101   : > { %976 = dma.done.wait (!%p758_p11), %s586_s18, 128  }
 0x102   : > { %978 = vsyncadd (!%p758_p11), %s586_s18, 4294967168  ;;  %s595_s0 = scalar_lea.sflag [#allocation11], %s585_s26 }
 0x103   : > { %980 = dma.done.wait (!%p758_p11), %s595_s0, 128  }
 0x104   : > { %982 = vsyncadd (!%p758_p11), %s595_s0, 4294967168  ;;  %s29_s25 = sadd.s32 1, %s1005_s25   ;;  %s1374_s20 = smov %s989_s21 }
 0x105   : > { %p26_p3 = scmp.ge.s32.totalorder %s29_s25, 4   ;;  %s1375_s21 = smov %s993_s22 }
 0x106   : > { %s1376_s22 = smov %s1109_s8  ;;  %s1377_s23 = smov %s1001_s24 }
 0x107   : > { %s1378_s24 = smov %s1380_s27  ;;  %28 = sbr.rel (!%p26_p3) target bundleno = 12 (0xc), region = 107 }
 0x10e   :  { %600 = vsyncpa [#allocation5], 1 }
 0x10f   :  { %602 = vsyncpa [#allocation5 + $0x1], 1 }
 0x110   :  { %603 = vsyncpa [#allocation8], 1 }
 0x111   :  { %605 = vsyncpa [#allocation8 + $0x1], 1 }
 0x112   :  { %606 = vsyncpa [#allocation6], 1 }
 0x113   :  { %608 = vsyncpa [#allocation6 + $0x1], 1 }
 0x114   :  { %609 = vsyncpa [#allocation11], 1 }
 0x115   :  { %611 = vsyncpa [#allocation11 + $0x1], 1 }

</bundles_post_ra>
